<compile_context>
chip_gen: v7x
topology: tpu7x:2x2x1
jax: 0.10.0
libtpu: 0.0.40
codegen_flags: <defaults>
</compile_context>

<pallas_src>
import jax
import jax.numpy as jnp
from jax.experimental import pallas as pl
from jax.experimental.pallas import tpu as pltpu

INPUT_SIZE = 4
HIDDEN_SIZE = 8
OUTPUT_SIZE = 3

MAX_BLOCK_B = 4096  # rows per grid step


def _round_up(x, m):
    return (x + m - 1) // m * m


def ann_kernel(x_ref, w1_ref, b1_ref, w2_ref, b2_ref, o_ref):
    # fc1: [bb,4] @ [4,8] + [1,8]  (MXU handles the small K by in-register padding)
    x = x_ref[...]
    h = jnp.dot(x, w1_ref[...], preferred_element_type=jnp.float32) + b1_ref[...]
    # ReLU on VPU
    h = jnp.maximum(h, 0.0)
    # fc2: [bb,8] @ [8,3] + [1,3]
    out = jnp.dot(h, w2_ref[...], preferred_element_type=jnp.float32) + b2_ref[...]
    o_ref[...] = out.astype(o_ref.dtype)


@jax.jit
def ann_forward(x, w1, b1, w2, b2):
    """x: [B, INPUT_SIZE] f32. Weights in x@W layout:
    w1: [INPUT_SIZE, HIDDEN_SIZE], b1: [HIDDEN_SIZE],
    w2: [HIDDEN_SIZE, OUTPUT_SIZE], b2: [OUTPUT_SIZE].
    Returns [B, OUTPUT_SIZE] f32."""
    B = x.shape[0]

    # >=2 programs whenever B > 8 (v7x megacore sharding), rows per step
    # capped at MAX_BLOCK_B and rounded to 8 sublanes.
    block_b = max(8, min(MAX_BLOCK_B, _round_up(-(-B // 2), 8)))
    b_pad = _round_up(B, block_b)
    grid = (b_pad // block_b,)

    # Cheap row pad only when needed (trace-time condition). Padded rows
    # produce relu(b1)@w2+b2 garbage that is sliced off below.
    if b_pad != B:
        x = jnp.concatenate(
            [x, jnp.zeros((b_pad - B, INPUT_SIZE), x.dtype)], axis=0)

    b1_2d = b1.reshape(1, HIDDEN_SIZE)
    b2_2d = b2.reshape(1, OUTPUT_SIZE)

    out = pl.pallas_call(
        ann_kernel,
        out_shape=jax.ShapeDtypeStruct((b_pad, OUTPUT_SIZE), jnp.float32),
        grid=grid,
        in_specs=[
            # x tiled over batch; last block dim equals the full array dim (4).
            pl.BlockSpec((block_b, INPUT_SIZE), lambda i: (i, 0)),
            # Tiny weights/biases stay fully resident in VMEM across steps.
            pl.BlockSpec((INPUT_SIZE, HIDDEN_SIZE), lambda i: (0, 0)),
            pl.BlockSpec((1, HIDDEN_SIZE), lambda i: (0, 0)),
            pl.BlockSpec((HIDDEN_SIZE, OUTPUT_SIZE), lambda i: (0, 0)),
            pl.BlockSpec((1, OUTPUT_SIZE), lambda i: (0, 0)),
        ],
        out_specs=pl.BlockSpec((block_b, OUTPUT_SIZE), lambda i: (i, 0)),
        compiler_params=pltpu.CompilerParams(
            dimension_semantics=("parallel",),
        ),
    )(x, w1, b1_2d, w2, b2_2d)

    if b_pad != B:
        out = out[:B]
    return out


def init_params(key):
    """Deterministic init mirroring nn.Linear's U(-1/sqrt(fan_in), 1/sqrt(fan_in))."""
    k1, k2, k3, k4 = jax.random.split(key, 4)
    bound1 = 1.0 / jnp.sqrt(INPUT_SIZE)
    bound2 = 1.0 / jnp.sqrt(HIDDEN_SIZE)
    w1 = jax.random.uniform(k1, (INPUT_SIZE, HIDDEN_SIZE), jnp.float32, -bound1, bound1)
    b1 = jax.random.uniform(k2, (HIDDEN_SIZE,), jnp.float32, -bound1, bound1)
    w2 = jax.random.uniform(k3, (HIDDEN_SIZE, OUTPUT_SIZE), jnp.float32, -bound2, bound2)
    b2 = jax.random.uniform(k4, (OUTPUT_SIZE,), jnp.float32, -bound2, bound2)
    return w1, b1, w2, b2


def _reference(x, w1, b1, w2, b2):
    return jnp.maximum(x @ w1 + b1, 0.0) @ w2 + b2


if __name__ == "__main__":
    key = jax.random.PRNGKey(0)
    k_params, k_x1, k_x2 = jax.random.split(key, 3)
    w1, b1, w2, b2 = init_params(k_params)

    # Small batch (matches module's scale); single-program grid path.
    x = jax.random.normal(k_x1, (8, INPUT_SIZE), jnp.float32)
    out = jax.block_until_ready(ann_forward(x, w1, b1, w2, b2))
    ref = _reference(x, w1, b1, w2, b2)
    assert out.shape == (8, OUTPUT_SIZE)
    assert jnp.allclose(out, ref, atol=1e-5, rtol=1e-5)

    # Non-multiple-of-block batch: exercises the row-pad + 2-program grid path.
    x2 = jax.random.normal(k_x2, (20, INPUT_SIZE), jnp.float32)
    out2 = jax.block_until_ready(ann_forward(x2, w1, b1, w2, b2))
    ref2 = _reference(x2, w1, b1, w2, b2)
    assert out2.shape == (20, OUTPUT_SIZE)
    assert jnp.allclose(out2, ref2, atol=1e-5, rtol=1e-5)

    print("KERNEL_OK")
</pallas_src>

<mosaic_0001>
module attributes {stable_mosaic.version = 11 : i64} {
  func.func @ann_kernel(%arg0: i32, %arg1: memref<8x4xf32, #tpu.memory_space<vmem>>, %arg2: memref<4x8xf32, #tpu.memory_space<vmem>>, %arg3: memref<1x8xf32, #tpu.memory_space<vmem>>, %arg4: memref<8x3xf32, #tpu.memory_space<vmem>>, %arg5: memref<1x3xf32, #tpu.memory_space<vmem>>, %arg6: memref<8x3xf32, #tpu.memory_space<vmem>>) attributes {dimension_semantics = [#tpu.dimension_semantics<parallel>], iteration_bounds = array<i64: 1>, scalar_prefetch = 0 : i64, scratch_operands = 0 : i64, tpu.core_type = #tpu.core_type<tc>, window_params = [{transform_indices = @transform_0, window_bounds = array<i64: 8, 4>}, {pipeline_mode = #tpu.pipeline_mode<synchronous>, transform_indices = @transform_1, window_bounds = array<i64: 4, 8>}, {pipeline_mode = #tpu.pipeline_mode<synchronous>, transform_indices = @transform_2, window_bounds = array<i64: 1, 8>}, {pipeline_mode = #tpu.pipeline_mode<synchronous>, transform_indices = @transform_3, window_bounds = array<i64: 8, 3>}, {pipeline_mode = #tpu.pipeline_mode<synchronous>, transform_indices = @transform_4, window_bounds = array<i64: 1, 3>}, {transform_indices = @transform_5, window_bounds = array<i64: 8, 3>}]} {
    %c0 = arith.constant 0 : index
    %c0_0 = arith.constant 0 : index
    %0 = vector.load %arg1[%c0, %c0_0] : memref<8x4xf32, #tpu.memory_space<vmem>>, vector<8x4xf32>
    %c0_1 = arith.constant 0 : index
    %c0_2 = arith.constant 0 : index
    %1 = vector.load %arg2[%c0_1, %c0_2] : memref<4x8xf32, #tpu.memory_space<vmem>>, vector<4x8xf32>
    %cst = arith.constant dense<0.000000e+00> : vector<8x8xf32>
    %2 = tpu.matmul %0, %1, %cst {dimension_numbers = #tpu.dot_dimension_numbers<[1], [0], [0], [1], [0, 0, 1, 1], [], []>} : vector<8x4xf32>, vector<4x8xf32>, vector<8x8xf32> -> vector<8x8xf32>
    %c0_3 = arith.constant 0 : index
    %c0_4 = arith.constant 0 : index
    %3 = vector.load %arg3[%c0_3, %c0_4] : memref<1x8xf32, #tpu.memory_space<vmem>>, vector<1x8xf32>
    %4 = vector.broadcast %3 : vector<1x8xf32> to vector<8x8xf32>
    %5 = arith.addf %2, %4 : vector<8x8xf32>
    %cst_5 = arith.constant 0.000000e+00 : f32
    %6 = vector.broadcast %cst_5 : f32 to vector<8x8xf32>
    %7 = arith.maximumf %5, %6 : vector<8x8xf32>
    %c0_6 = arith.constant 0 : index
    %c0_7 = arith.constant 0 : index
    %8 = vector.load %arg4[%c0_6, %c0_7] : memref<8x3xf32, #tpu.memory_space<vmem>>, vector<8x3xf32>
    %cst_8 = arith.constant dense<0.000000e+00> : vector<8x3xf32>
    %9 = tpu.matmul %7, %8, %cst_8 {dimension_numbers = #tpu.dot_dimension_numbers<[1], [0], [0], [1], [0, 0, 1, 1], [], []>} : vector<8x8xf32>, vector<8x3xf32>, vector<8x3xf32> -> vector<8x3xf32>
    %c0_9 = arith.constant 0 : index
    %c0_10 = arith.constant 0 : index
    %10 = vector.load %arg5[%c0_9, %c0_10] : memref<1x3xf32, #tpu.memory_space<vmem>>, vector<1x3xf32>
    %11 = vector.broadcast %10 : vector<1x3xf32> to vector<8x3xf32>
    %12 = arith.addf %9, %11 : vector<8x3xf32>
    %c0_11 = arith.constant 0 : index
    %c0_12 = arith.constant 0 : index
    %13 = vector.load %arg6[%c0_11, %c0_12] : memref<8x3xf32, #tpu.memory_space<vmem>>, vector<8x3xf32>
    tpu.vector_store %arg6[%c0_11, %c0_12], %12 {strides = array<i32>} : memref<8x3xf32, #tpu.memory_space<vmem>>, vector<8x3xf32>,
    return
  }
  func.func @transform_0(%arg0: i32) -> (i32, i32) {
    %c0_i32 = arith.constant 0 : i32
    %c0_i32_0 = arith.constant 0 : i32
    return %arg0, %c0_i32 : i32, i32
  }
  func.func @transform_1(%arg0: i32) -> (i32, i32) {
    %c0_i32 = arith.constant 0 : i32
    %c0_i32_0 = arith.constant 0 : i32
    %c0_i32_1 = arith.constant 0 : i32
    return %c0_i32, %c0_i32_0 : i32, i32
  }
  func.func @transform_2(%arg0: i32) -> (i32, i32) {
    %c0_i32 = arith.constant 0 : i32
    %c0_i32_0 = arith.constant 0 : i32
    %c0_i32_1 = arith.constant 0 : i32
    return %c0_i32, %c0_i32_0 : i32, i32
  }
  func.func @transform_3(%arg0: i32) -> (i32, i32) {
    %c0_i32 = arith.constant 0 : i32
    %c0_i32_0 = arith.constant 0 : i32
    %c0_i32_1 = arith.constant 0 : i32
    return %c0_i32, %c0_i32_0 : i32, i32
  }
  func.func @transform_4(%arg0: i32) -> (i32, i32) {
    %c0_i32 = arith.constant 0 : i32
    %c0_i32_0 = arith.constant 0 : i32
    %c0_i32_1 = arith.constant 0 : i32
    return %c0_i32, %c0_i32_0 : i32, i32
  }
  func.func @transform_5(%arg0: i32) -> (i32, i32) {
    %c0_i32 = arith.constant 0 : i32
    %c0_i32_0 = arith.constant 0 : i32
    return %arg0, %c0_i32 : i32, i32
  }
}

</mosaic_0001>

<bundles_post_ra>
// kernel: ann_forward.1
= control target key start
LH: loop header
LB: loop body
LE: loop exit
PB: predicated region body
PF: predicated region fallthrough
CT: control target
= control target key end

     0   :  { %vm33_vm0 = vcmask 1043456   ;;  %vm29_vm1 = vcmask 31744   ;;  %v217_v0 = vmov 0.0   ;;  %vm218_vm2 = vmmov 0   ;;  %s267_s1 = inlined_call_operand.vmem [shape: f32[4,8], index: 1, kind: input, shape index: {}]   ;;  %s268_s0 = inlined_call_operand.vmem [shape: f32[8,4], index: 0, kind: input, shape index: {}]   ;;  %s269_s3 = inlined_call_operand.vmem [shape: f32[8,3], index: 3, kind: input, shape index: {}]   ;;  %s270_s2 = inlined_call_operand.vmem [shape: f32[1,8], index: 2, kind: input, shape index: {}]   ;;  %s271_s4 = inlined_call_operand.vmem [shape: f32[1,3], index: 4, kind: input, shape index: {}]   ;;  %s272_s5 = inlined_call_operand.vmem [shape: f32[8,3], index: 5, kind: output, shape index: {}]  }
   0x1   :  { %205 = vmatprep.subr.mxu0 %v217_v0  ;;  %v21_v1 = vld [vmem:[%s267_s1] sm:$0xf]  ;;  %207 = vmatprep.mubr.msk.f32.mxu0 %vm218_vm2, %v217_v0  ;;  %vm116_vm3 = vcmask 64512   ;;  %vm190_vm4 = vcmask 23552  }
   0x2   :  { %v20_v2 = vld [vmem:[%s268_s0] sm:$0xff]  ;;  %206 = vmatpush3.msk.msra.mxu0 %vm33_vm0, %v21_v1  ;;  %210 = vmatprep.subr.mxu1 %v217_v0 }
   0x3   :  { %208 = vmatmul.mubr.msk.f32.vlgmr.msra.gmra.mrb[0].mxu0 %vm29_vm1, %v20_v2  ;;  %212 = vmatprep.mubr.msk.f32.mxu1 %vm218_vm2, %v217_v0  ;;  %v108_v3 = vld [vmem:[%s269_s3] sm:$0xff] }
   0x4   :  { %211 = vmatpush3.msra.mxu1 %v108_v3  ;;  %v196_v4 = vld [vmem:[%s270_s2] ss:$0 sm:$0xff] }
   0x5   :  { %v199_v9 = vld [vmem:[%s271_s4] ss:$0 sm:$0xff] }
  0xd6   :  { %v103_v5 = vpop.f32.mrb[0].mxu0 }
  0xd7   :  { %v104_v6 = vadd.f32 %v196_v4, %v103_v5  ;;  %v209_v7 = vpop.f32.mrb[1].mxu0 }
  0xd9   :  { %v107_v8 = vmax.f32 %v104_v6, 0.0 }
  0xdb   :  { %213 = vmatmul.mubr.msk.f32.vlgmr.msra.gmra.mrb[0].mxu1 %vm116_vm3, %v107_v8 }
 0x1ae   :  { %v186_v10 = vpop.f32.mrb[0].mxu1 }
 0x1af   :  { %v187_v11 = vadd.f32 %v199_v9, %v186_v10  ;;  %v214_v12 = vpop.f32.mrb[1].mxu1 }
 0x1b1   :  { %191 = vst.msk [vmem:[%s272_s5] sm:$0xff] %vm190_vm4, %v187_v11 }

</bundles_post_ra>
